<compile_context>
chip_gen: v7x
topology: tpu7x:2x2x1
jax: 0.10.0
libtpu: 0.0.40
codegen_flags: <defaults>
</compile_context>

<pallas_src>
import jax
import jax.numpy as jnp
from jax.experimental import pallas as pl
from jax.experimental.pallas import tpu as pltpu


def _vmem_capacity_bytes():
    """Best-effort per-TensorCore VMEM capacity; conservative default = v7x."""
    try:
        return int(pltpu.get_tpu_info().vmem_capacity_bytes)
    except Exception:
        return 64 * 1024 * 1024


# --------------------------------------------------------------------------
# Default path: HBM row gather.  Table and output both stay in HBM; B small
# concurrent row DMAs move only the rows actually needed.
# --------------------------------------------------------------------------
def _make_hbm_gather_kernel(batch, n_classes):
    def kernel(ids_ref, table_hbm, out_hbm, copy_sems):
        # ids_ref:   SMEM (B,) int32              (scalar prefetch)
        # table_hbm: HBM  (n_classes, embed_dim)  raw ref (memory_space=ANY)
        # out_hbm:   HBM  (B, 1, embed_dim)       raw ref (memory_space=ANY)
        # copy_sems: DMA semaphores, one per row  -> all fetches in flight at once
        copies = []
        for i in range(batch):                      # B is a trace-time constant
            idx = jnp.clip(ids_ref[i], 0, n_classes - 1)
            cp = pltpu.make_async_copy(
                table_hbm.at[idx],                  # (embed_dim,) src row
                out_hbm.at[i, 0],                   # (embed_dim,) dst row
                copy_sems.at[i])
            cp.start()
            copies.append(cp)                       # keep descriptors for wait
        for cp in copies:                           # wait on the SAME descriptors
            cp.wait()
    return kernel


def _gather_forward(ids, table):
    B = ids.shape[0]
    n_classes, embed_dim = table.shape
    dt = table.dtype
    row_bytes = embed_dim * jnp.dtype(dt).itemsize

    return pl.pallas_call(
        _make_hbm_gather_kernel(B, n_classes),
        out_shape=jax.ShapeDtypeStruct((B, 1, embed_dim), dt),
        grid_spec=pltpu.PrefetchScalarGridSpec(
            num_scalar_prefetch=1,                  # ids land in SMEM
            grid=(1,),                              # single step, no per-row grid overhead
            in_specs=[pl.BlockSpec(memory_space=pl.ANY)],    # table stays in HBM
            out_specs=pl.BlockSpec(memory_space=pl.ANY),     # output written by DMA, no VMEM bounce
            scratch_shapes=[pltpu.SemaphoreType.DMA((B,))],
        ),
        compiler_params=pltpu.CompilerParams(
            dimension_semantics=("arbitrary",),
            vmem_limit_bytes=4 * 1024 * 1024,       # essentially nothing lives in VMEM
        ),
        cost_estimate=pl.CostEstimate(
            flops=0, transcendentals=0,
            bytes_accessed=int(2 * B * row_bytes + 4 * B)),
    )(ids, table)


# --------------------------------------------------------------------------
# Resident path: whole table in VMEM + MXU one-hot gather.  Only chosen when
# the gathered rows are a sizable fraction of the table (large B), so the
# one-time table stream amortizes over many rows.
# --------------------------------------------------------------------------
def _make_one_hot_kernel(n_classes):
    def kernel(ids_ref, table_ref, out_ref):
        # ids_ref:   VMEM (B, 1) int32
        # table_ref: VMEM (n_classes, embed_dim)
        # out_ref:   VMEM (B, 1, embed_dim)
        ids = jnp.clip(ids_ref[...], 0, n_classes - 1)                 # (B, 1)
        iota = jax.lax.broadcasted_iota(jnp.int32,
                                        (ids.shape[0], n_classes), 1)  # (B, n_classes)
        one_hot = (iota == ids).astype(table_ref.dtype)
        acc = jnp.dot(one_hot, table_ref[...],
                      preferred_element_type=jnp.float32,
                      precision=jax.lax.Precision.HIGHEST)             # MXU gather
        out_ref[:, 0, :] = acc.astype(out_ref.dtype)                   # one dense store
    return kernel


def _resident_forward(ids, table):
    B = ids.shape[0]
    n_classes, embed_dim = table.shape
    dt = table.dtype
    itemsize = jnp.dtype(dt).itemsize
    ids2d = ids.reshape(B, 1)

    table_bytes = n_classes * embed_dim * itemsize
    one_hot_bytes = B * n_classes * itemsize
    out_bytes = B * embed_dim * itemsize
    # No grid -> single-buffered residency (Buffered(1) intent): 1x per operand.
    vmem_need = table_bytes + one_hot_bytes + 2 * out_bytes + (2 << 20)
    capacity = _vmem_capacity_bytes()
    vmem_limit = max(4 * 1024 * 1024, min(int(0.9 * capacity), int(vmem_need)))

    return pl.pallas_call(
        _make_one_hot_kernel(n_classes),
        out_shape=jax.ShapeDtypeStruct((B, 1, embed_dim), dt),
        in_specs=[pl.BlockSpec(memory_space=pltpu.MemorySpace.VMEM),   # ids (B,1)
                  pl.BlockSpec(memory_space=pltpu.MemorySpace.VMEM)],  # full table
        out_specs=pl.BlockSpec(memory_space=pltpu.MemorySpace.VMEM),
        compiler_params=pltpu.CompilerParams(vmem_limit_bytes=vmem_limit),
        cost_estimate=pl.CostEstimate(
            flops=2 * B * n_classes * embed_dim, transcendentals=0,
            bytes_accessed=int(table_bytes + out_bytes + 4 * B)),
    )(ids2d, table)


# --------------------------------------------------------------------------
# Public wrapper: ClassEmbedder.forward
# --------------------------------------------------------------------------
def class_embedder_forward(batch, embedding_table, key="class", *, force_path=None):
    """Pallas implementation of ClassEmbedder.forward -> (B, 1, embed_dim)."""
    ids = jnp.asarray(batch[key]).astype(jnp.int32).reshape(-1)        # (B,)
    B = ids.shape[0]
    n_classes, embed_dim = embedding_table.shape
    itemsize = jnp.dtype(embedding_table.dtype).itemsize

    table_bytes = n_classes * embed_dim * itemsize
    gather_bytes = B * embed_dim * itemsize
    one_hot_bytes = B * n_classes * itemsize
    fits_vmem = (table_bytes + one_hot_bytes + 2 * gather_bytes + (4 << 20)
                 ) <= int(0.8 * _vmem_capacity_bytes())

    if force_path == "gather":
        use_resident = False
    elif force_path == "resident":
        use_resident = True
    else:
        # Bandwidth-based decision: stream the whole table only when the rows
        # we actually need are a sizable fraction of it (the 8x factor covers
        # per-row DMA-issue overhead).  For ClassEmbedder (B << n_classes)
        # this always picks the HBM row-gather path.
        use_resident = fits_vmem and (table_bytes <= 8 * gather_bytes)

    if use_resident:
        return _resident_forward(ids, embedding_table)
    return _gather_forward(ids, embedding_table)


if __name__ == "__main__":
    n_classes = 1000
    embed_dim = 128
    B = 2

    root = jax.random.PRNGKey(0)
    k_emb, k_ids = jax.random.split(root)

    # Deterministic synthetic weights; nn.Embedding default init is N(0, 1).
    embedding_table = jax.random.normal(
        k_emb, (n_classes, embed_dim), dtype=jnp.float32)
    class_ids = jax.random.randint(k_ids, (B,), 0, n_classes, dtype=jnp.int32)
    batch = {"class": class_ids}

    ref = embedding_table[class_ids][:, None, :]

    # Default path: bandwidth-based selection -> HBM row gather (B << n_classes).
    c = jax.block_until_ready(class_embedder_forward(batch, embedding_table))
    assert c.shape == (B, 1, embed_dim), c.shape
    assert c.dtype == jnp.float32
    assert jnp.allclose(c, ref), "HBM row-gather path mismatch vs reference"

    # Coverage: VMEM-resident MXU one-hot gather path (auto-selected only for
    # very large batches relative to the table); forced here for testing.
    c2 = jax.block_until_ready(
        class_embedder_forward(batch, embedding_table, force_path="resident"))
    assert c2.shape == (B, 1, embed_dim), c2.shape
    assert jnp.allclose(c2, ref, rtol=1e-2, atol=1e-2), \
        "MXU one-hot resident path mismatch vs reference"

    print("KERNEL_OK")
</pallas_src>

<mosaic_0001>
module attributes {stable_mosaic.version = 11 : i64} {
  func.func @kernel(%arg0: i32, %arg1: memref<2xi32, #tpu.memory_space<smem>>, %arg2: memref<1000x128xf32, #tpu.memory_space<any>>, %arg3: memref<2x1x128xf32, #tpu.memory_space<any>>, %arg4: memref<2x!tpu.dma_semaphore, #tpu.memory_space<semaphore_mem>>) attributes {dimension_semantics = [#tpu.dimension_semantics<arbitrary>], iteration_bounds = array<i64: 1>, scalar_prefetch = 1 : i64, scratch_operands = 1 : i64, tpu.core_type = #tpu.core_type<tc>, window_params = [{}, {}]} {
    %c0 = arith.constant 0 : index
    %0 = memref.load %arg1[%c0] : memref<2xi32, #tpu.memory_space<smem>>
    %c0_i32 = arith.constant 0 : i32
    %c999_i32 = arith.constant 999 : i32
    %1 = arith.maxsi %c0_i32, %0 : i32
    %2 = arith.minsi %c999_i32, %1 : i32
    %c0_i32_0 = arith.constant 0 : i32
    %c0_i32_1 = arith.constant 0 : i32
    %c0_i32_2 = arith.constant 0 : i32
    %c0_i32_3 = arith.constant 0 : i32
    %3 = tpu.memref_slice %arg2[%2, %c0_i32_3] : memref<1000x128xf32, #tpu.memory_space<any>> -> memref<1x128xf32, #tpu.memory_space<any>>
    %4 = tpu.memref_squeeze %3 : memref<1x128xf32, #tpu.memory_space<any>> -> memref<128xf32, #tpu.memory_space<any>>
    %c0_i32_4 = arith.constant 0 : i32
    %5 = tpu.memref_slice %arg3[%c0_i32_0, %c0_i32_1, %c0_i32_4] : memref<2x1x128xf32, #tpu.memory_space<any>> -> memref<1x1x128xf32, #tpu.memory_space<any>>
    %6 = tpu.memref_squeeze %5 : memref<1x1x128xf32, #tpu.memory_space<any>> -> memref<128xf32, #tpu.memory_space<any>>
    %7 = tpu.memref_slice %arg4[%c0_i32_2] : memref<2x!tpu.dma_semaphore, #tpu.memory_space<semaphore_mem>> -> memref<1x!tpu.dma_semaphore, #tpu.memory_space<semaphore_mem>>
    %8 = tpu.memref_squeeze %7 : memref<1x!tpu.dma_semaphore, #tpu.memory_space<semaphore_mem>> -> memref<!tpu.dma_semaphore, #tpu.memory_space<semaphore_mem>>
    tpu.enqueue_dma source(%4 : memref<128xf32, #tpu.memory_space<any>>) target(%6 : memref<128xf32, #tpu.memory_space<any>>) target_semaphore(%8 : memref<!tpu.dma_semaphore, #tpu.memory_space<semaphore_mem>>)
    %c1 = arith.constant 1 : index
    %9 = memref.load %arg1[%c1] : memref<2xi32, #tpu.memory_space<smem>>
    %c0_i32_5 = arith.constant 0 : i32
    %c999_i32_6 = arith.constant 999 : i32
    %10 = arith.maxsi %c0_i32_5, %9 : i32
    %11 = arith.minsi %c999_i32_6, %10 : i32
    %c1_i32 = arith.constant 1 : i32
    %c0_i32_7 = arith.constant 0 : i32
    %c1_i32_8 = arith.constant 1 : i32
    %c0_i32_9 = arith.constant 0 : i32
    %12 = tpu.memref_slice %arg2[%11, %c0_i32_9] : memref<1000x128xf32, #tpu.memory_space<any>> -> memref<1x128xf32, #tpu.memory_space<any>>
    %13 = tpu.memref_squeeze %12 : memref<1x128xf32, #tpu.memory_space<any>> -> memref<128xf32, #tpu.memory_space<any>>
    %c0_i32_10 = arith.constant 0 : i32
    %14 = tpu.memref_slice %arg3[%c1_i32, %c0_i32_7, %c0_i32_10] : memref<2x1x128xf32, #tpu.memory_space<any>> -> memref<1x1x128xf32, #tpu.memory_space<any>>
    %15 = tpu.memref_squeeze %14 : memref<1x1x128xf32, #tpu.memory_space<any>> -> memref<128xf32, #tpu.memory_space<any>>
    %16 = tpu.memref_slice %arg4[%c1_i32_8] : memref<2x!tpu.dma_semaphore, #tpu.memory_space<semaphore_mem>> -> memref<1x!tpu.dma_semaphore, #tpu.memory_space<semaphore_mem>>
    %17 = tpu.memref_squeeze %16 : memref<1x!tpu.dma_semaphore, #tpu.memory_space<semaphore_mem>> -> memref<!tpu.dma_semaphore, #tpu.memory_space<semaphore_mem>>
    tpu.enqueue_dma source(%13 : memref<128xf32, #tpu.memory_space<any>>) target(%15 : memref<128xf32, #tpu.memory_space<any>>) target_semaphore(%17 : memref<!tpu.dma_semaphore, #tpu.memory_space<semaphore_mem>>)
    %c0_i32_11 = arith.constant 0 : i32
    %c0_i32_12 = arith.constant 0 : i32
    %c0_i32_13 = arith.constant 0 : i32
    %c0_i32_14 = arith.constant 0 : i32
    %18 = tpu.memref_slice %arg2[%2, %c0_i32_14] : memref<1000x128xf32, #tpu.memory_space<any>> -> memref<1x128xf32, #tpu.memory_space<any>>
    %19 = tpu.memref_squeeze %18 : memref<1x128xf32, #tpu.memory_space<any>> -> memref<128xf32, #tpu.memory_space<any>>
    %c0_i32_15 = arith.constant 0 : i32
    %20 = tpu.memref_slice %arg3[%c0_i32_11, %c0_i32_12, %c0_i32_15] : memref<2x1x128xf32, #tpu.memory_space<any>> -> memref<1x1x128xf32, #tpu.memory_space<any>>
    %21 = tpu.memref_squeeze %20 : memref<1x1x128xf32, #tpu.memory_space<any>> -> memref<128xf32, #tpu.memory_space<any>>
    %22 = tpu.memref_slice %arg4[%c0_i32_13] : memref<2x!tpu.dma_semaphore, #tpu.memory_space<semaphore_mem>> -> memref<1x!tpu.dma_semaphore, #tpu.memory_space<semaphore_mem>>
    %23 = tpu.memref_squeeze %22 : memref<1x!tpu.dma_semaphore, #tpu.memory_space<semaphore_mem>> -> memref<!tpu.dma_semaphore, #tpu.memory_space<semaphore_mem>>
    tpu.wait_dma2 semaphore(%23 : memref<!tpu.dma_semaphore, #tpu.memory_space<semaphore_mem>>) src(%19 : memref<128xf32, #tpu.memory_space<any>>) dst(%21 : memref<128xf32, #tpu.memory_space<any>>)
    %c1_i32_16 = arith.constant 1 : i32
    %c0_i32_17 = arith.constant 0 : i32
    %c1_i32_18 = arith.constant 1 : i32
    %c0_i32_19 = arith.constant 0 : i32
    %24 = tpu.memref_slice %arg2[%11, %c0_i32_19] : memref<1000x128xf32, #tpu.memory_space<any>> -> memref<1x128xf32, #tpu.memory_space<any>>
    %25 = tpu.memref_squeeze %24 : memref<1x128xf32, #tpu.memory_space<any>> -> memref<128xf32, #tpu.memory_space<any>>
    %c0_i32_20 = arith.constant 0 : i32
    %26 = tpu.memref_slice %arg3[%c1_i32_16, %c0_i32_17, %c0_i32_20] : memref<2x1x128xf32, #tpu.memory_space<any>> -> memref<1x1x128xf32, #tpu.memory_space<any>>
    %27 = tpu.memref_squeeze %26 : memref<1x1x128xf32, #tpu.memory_space<any>> -> memref<128xf32, #tpu.memory_space<any>>
    %28 = tpu.memref_slice %arg4[%c1_i32_18] : memref<2x!tpu.dma_semaphore, #tpu.memory_space<semaphore_mem>> -> memref<1x!tpu.dma_semaphore, #tpu.memory_space<semaphore_mem>>
    %29 = tpu.memref_squeeze %28 : memref<1x!tpu.dma_semaphore, #tpu.memory_space<semaphore_mem>> -> memref<!tpu.dma_semaphore, #tpu.memory_space<semaphore_mem>>
    tpu.wait_dma2 semaphore(%29 : memref<!tpu.dma_semaphore, #tpu.memory_space<semaphore_mem>>) src(%25 : memref<128xf32, #tpu.memory_space<any>>) dst(%27 : memref<128xf32, #tpu.memory_space<any>>)
    return
  }
}

</mosaic_0001>

<bundles_post_ra>
// kernel: tpu_custom_call.1
= control target key start
LH: loop header
LB: loop body
LE: loop exit
PB: predicated region body
PF: predicated region fallthrough
CT: control target
= control target key end

     0   :  { %s160_s0 = inlined_call_operand.hbm [shape: s32[2], index: 0, kind: input, shape index: {}]   ;;  %s161_s1 = inlined_call_operand.hbm [shape: f32[1000,128], index: 1, kind: input, shape index: {}]   ;;  %s162_s2 = inlined_call_operand.hbm [shape: f32[2,1,128], index: 2, kind: output, shape index: {}]  }
   0x1   :  { %s99_s11 = scalar_lea.hbm %s160_s0, 16 }
   0x2   :  { %p100_p0 = scmp.ne.s32.totalorder %s160_s0, %s99_s11  ;;  %p103_p1 = scmp.lt.u32.totalorder %s99_s11, %s160_s0 }
   0x4   :  { %p105_p2 = pnand %p103_p1, %p100_p0 }
   0x6   :  { %108 = shalt.err (!%p105_p2)  }
   0x7   :  { %s115_s16 = smov [#allocation4]  }
   0x8   :  { %8 = dma.hbm_to_smem %s160_s0, 16, %s115_s16, [#allocation3] }
   0x9   :  { %109 = dma.done.wait [#allocation3], 16 }
   0xa   :  { %110 = vsyncadd [#allocation3], 4294967280 }
   0xb   :  { %10 = sfence }
   0xc   :  { %s11_s19 = sld [smem:[#allocation4]]  ;;  %s116_s24 = smov [#allocation2]  }
   0xd   :  { %s117_s25 = smov [#allocation5]   ;;  %s118_s26 = smov 0  }
   0xe   :  { %s38_s3 = scalar_lea.hbm %s162_s2, 16  ;;  %s119_s8 = smov [#allocation2 + $0x1]  }
   0xf   :  { %s120_s9 = smov [#allocation7]  }
  0x12   :  { %p12_p3 = scmp.gt.s32.totalorder %s11_s19, 0  ;;  %p74_p4 = scmp.lt.s32.totalorder %s11_s19, 999 }
  0x14   :  { %s164_s19 = smov (!%p12_p3, %s11_s19), 0 }
  0x15   :  { %s166_s19 = smov (!%p74_p4, %s164_s19), 999 }
  0x16   :  { %s79_s20 = sshll.u32 %s166_s19, 4 }
  0x17   :  { %s17_s23 = scalar_lea.hbm %s161_s1, %s79_s20 }
  0x18   :  { %30 = dma.general %s17_s23, 16, %s162_s2, %s116_s24, %s117_s25, [#allocation6], %s118_s26, 0  }
  0x19   :  { %s80_s0 = sld [smem:[#allocation4 + $0x1]] }
  0x1f   :  { %p32_p5 = scmp.gt.s32.totalorder %s80_s0, 0  ;;  %p81_p6 = scmp.lt.s32.totalorder %s80_s0, 999 }
  0x21   :  { %s168_s0 = smov (!%p32_p5, %s80_s0), 0 }
  0x22   :  { %s170_s0 = smov (!%p81_p6, %s168_s0), 999 }
  0x23   :  { %s86_s4 = sshll.u32 %s170_s0, 4 }
  0x24   :  { %s37_s7 = scalar_lea.hbm %s161_s1, %s86_s4 }
  0x25   :  { %52 = dma.general %s37_s7, 16, %s38_s3, %s119_s8, %s120_s9, [#allocation8], %s118_s26, 0  }
  0x26   :  { %111 = dma.done.wait [#allocation2], 16 }
  0x27   :  { %112 = vsyncadd [#allocation2], 4294967280 }
  0x28   :  { %113 = dma.done.wait [#allocation2 + $0x1], 16 }
  0x29   :  { %114 = vsyncadd [#allocation2 + $0x1], 4294967280 }
  0x2a   :  { %57 = vsyncmov [#allocation2] }
  0x2d   :  { %s58_s10 = vpop.sfrf %57 }
  0x2e   :  { %p87_p7 = scmp.ne.s32.totalorder %s58_s10, 0 }
  0x30   :  { %62 = shalt.err (%p87_p7)  }
  0x31   :  { %64 = vsyncmov [#allocation2 + $0x1] }
  0x34   :  { %s65_s11 = vpop.sfrf %64 }
  0x35   :  { %p88_p8 = scmp.ne.s32.totalorder %s65_s11, 0 }
  0x37   :  { %69 = shalt.err (%p88_p8)  }

</bundles_post_ra>
